<compile_context>
chip_gen: v6e
topology: v6e:2x2x1
jax: 0.10.0
libtpu: 0.0.40
codegen_flags: <defaults>
</compile_context>

<pallas_src>
import functools

import jax
import jax.numpy as jnp
from jax.experimental import pallas as pl
from jax.experimental.pallas import tpu as pltpu

_SUBLANE = 8
_DEFAULT_TILE_B = 8192  # batch rows per grid step (multiple of 8)


def _antnet_kernel(x_ref, w1_ref, b1_ref, w2_ref, b2_ref, o_ref):
    # Per grid step:
    #   x_ref:  (TB, In)   w1_ref: (H, In)   b1_ref: (1, H)
    #   w2_ref: (Out, H)   b2_ref: (1, Out)  o_ref:  (TB, Out)
    x = x_ref[...]
    # fc1: x @ W1^T -- contract the In axis of both operands (A @ B^T form,
    # PyTorch (out, in) weight layout used directly, no transposes anywhere).
    h = jax.lax.dot_general(
        x, w1_ref[...],
        dimension_numbers=(((1,), (1,)), ((), ())),
        preferred_element_type=jnp.float32)                 # (TB, H)
    h = jnp.maximum(h + b1_ref[...], 0.0)                   # bias + ReLU
    # fc2: h @ W2^T
    y = jax.lax.dot_general(
        h, w2_ref[...],
        dimension_numbers=(((1,), (1,)), ((), ())),
        preferred_element_type=jnp.float32)                 # (TB, Out)
    o_ref[...] = (y + b2_ref[...]).astype(o_ref.dtype)


def prepare_params(w1, b1, w2, b2):
    """One-time parameter prep (hoisted out of the per-call hot path)."""
    w1_k = jnp.asarray(w1, jnp.float32)                 # (H, In)
    b1_k = jnp.asarray(b1, jnp.float32).reshape(1, -1)  # (1, H): broadcasts over batch rows
    w2_k = jnp.asarray(w2, jnp.float32)                 # (Out, H)
    b2_k = jnp.asarray(b2, jnp.float32).reshape(1, -1)  # (1, Out)
    return w1_k, b1_k, w2_k, b2_k


def _round_up(n, m):
    return ((n + m - 1) // m) * m


@functools.partial(jax.jit, static_argnames=("tile_b",))
def antnet_forward(x, params, *, tile_b=_DEFAULT_TILE_B):
    """x: (B, In).  params: output of prepare_params.  Returns (B, Out) f32."""
    w1_k, b1_k, w2_k, b2_k = params
    B, In = x.shape
    H = w1_k.shape[0]
    Out = w2_k.shape[0]
    x = x.astype(jnp.float32)

    # Tile only the batch (sublane) axis; never bigger than the (8-rounded)
    # batch so tiny batches stay a single tiny tile.  No jnp.pad / no slice:
    # Pallas clips the partial edge block (rows are independent, so garbage in
    # clipped input rows never reaches a stored output row).
    tb = max(_SUBLANE, min(_round_up(tile_b, _SUBLANE), _round_up(B, _SUBLANE)))
    grid = (pl.cdiv(B, tb),)

    n_param = w1_k.size + b1_k.size + w2_k.size + b2_k.size
    cost = pl.CostEstimate(
        flops=2 * B * (In * H + H * Out),
        transcendentals=0,
        bytes_accessed=4 * (B * (In + Out) + n_param),
    )

    resident = lambda shape: pl.BlockSpec(shape, lambda i: (0, 0))

    return pl.pallas_call(
        _antnet_kernel,
        out_shape=jax.ShapeDtypeStruct((B, Out), jnp.float32),
        grid=grid,
        in_specs=[
            pl.BlockSpec((tb, In), lambda i: (i, 0)),   # x streams over batch tiles
            resident((H, In)),                          # weights/biases stay resident
            resident((1, H)),
            resident((Out, H)),
            resident((1, Out)),
        ],
        out_specs=pl.BlockSpec((tb, Out), lambda i: (i, 0)),
        compiler_params=pltpu.CompilerParams(
            # On v7x, pltpu.CORE_PARALLEL here shards batch tiles across both
            # TensorCores; "parallel" kept for portability across gens.
            dimension_semantics=("parallel",),
            # (tb, 5)/(tb, 4) blocks lane-pad to 128 in VMEM; 32 MiB is within
            # physical VMEM on v5e/v6e (128 MiB) and v7x (64 MiB per TC).
            vmem_limit_bytes=32 * 1024 * 1024,
        ),
        cost_estimate=cost,
    )(x, w1_k, b1_k, w2_k, b2_k)


def antnet_reference(x, w1, b1, w2, b2):
    """Pure-JAX reference matching PyTorch semantics."""
    h = jnp.maximum(x @ w1.T + b1, 0.0)
    return h @ w2.T + b2


if __name__ == "__main__":
    input_size, hidden_size, output_size = 5, 16, 4

    key = jax.random.PRNGKey(0)
    kx, k1, k2, k3, k4, kx2 = jax.random.split(key, 6)

    # Deterministic parameter init (PyTorch Linear uses U(-1/sqrt(in), 1/sqrt(in))).
    bound1 = 1.0 / (input_size ** 0.5)
    bound2 = 1.0 / (hidden_size ** 0.5)
    w1 = jax.random.uniform(k1, (hidden_size, input_size), jnp.float32, -bound1, bound1)
    b1 = jax.random.uniform(k2, (hidden_size,), jnp.float32, -bound1, bound1)
    w2 = jax.random.uniform(k3, (output_size, hidden_size), jnp.float32, -bound2, bound2)
    b2 = jax.random.uniform(k4, (output_size,), jnp.float32, -bound2, bound2)

    params = prepare_params(w1, b1, w2, b2)

    # Small batch (typical module use): single tiny tile, single grid step.
    x_small = jax.random.normal(kx, (8, input_size), dtype=jnp.float32)
    out_small = jax.block_until_ready(antnet_forward(x_small, params))
    ref_small = antnet_reference(x_small, w1, b1, w2, b2)
    assert out_small.shape == (8, output_size), out_small.shape
    assert jnp.allclose(out_small, ref_small, atol=2e-2, rtol=2e-2), "small-batch mismatch"

    # Ragged batch: multi-tile grid with a clipped edge block (no pad / slice).
    x_big = jax.random.normal(kx2, (333, input_size), dtype=jnp.float32)
    out_big = jax.block_until_ready(antnet_forward(x_big, params, tile_b=128))
    ref_big = antnet_reference(x_big, w1, b1, w2, b2)
    assert out_big.shape == (333, output_size), out_big.shape
    assert jnp.allclose(out_big, ref_big, atol=2e-2, rtol=2e-2), "big-batch mismatch"

    print("KERNEL_OK")
</pallas_src>

<mosaic_0001>
module attributes {stable_mosaic.version = 11 : i64} {
  func.func @_antnet_kernel(%arg0: i32, %arg1: memref<8x5xf32, #tpu.memory_space<vmem>>, %arg2: memref<16x5xf32, #tpu.memory_space<vmem>>, %arg3: memref<1x16xf32, #tpu.memory_space<vmem>>, %arg4: memref<4x16xf32, #tpu.memory_space<vmem>>, %arg5: memref<1x4xf32, #tpu.memory_space<vmem>>, %arg6: memref<8x4xf32, #tpu.memory_space<vmem>>) attributes {dimension_semantics = [#tpu.dimension_semantics<parallel>], iteration_bounds = array<i64: 1>, scalar_prefetch = 0 : i64, scratch_operands = 0 : i64, tpu.core_type = #tpu.core_type<tc>, window_params = [{transform_indices = @transform_0, window_bounds = array<i64: 8, 5>}, {pipeline_mode = #tpu.pipeline_mode<synchronous>, transform_indices = @transform_1, window_bounds = array<i64: 16, 5>}, {pipeline_mode = #tpu.pipeline_mode<synchronous>, transform_indices = @transform_2, window_bounds = array<i64: 1, 16>}, {pipeline_mode = #tpu.pipeline_mode<synchronous>, transform_indices = @transform_3, window_bounds = array<i64: 4, 16>}, {pipeline_mode = #tpu.pipeline_mode<synchronous>, transform_indices = @transform_4, window_bounds = array<i64: 1, 4>}, {transform_indices = @transform_5, window_bounds = array<i64: 8, 4>}]} {
    %c0 = arith.constant 0 : index
    %c0_0 = arith.constant 0 : index
    %0 = vector.load %arg1[%c0, %c0_0] : memref<8x5xf32, #tpu.memory_space<vmem>>, vector<8x5xf32>
    %c0_1 = arith.constant 0 : index
    %c0_2 = arith.constant 0 : index
    %1 = vector.load %arg2[%c0_1, %c0_2] : memref<16x5xf32, #tpu.memory_space<vmem>>, vector<16x5xf32>
    %cst = arith.constant dense<0.000000e+00> : vector<8x16xf32>
    %2 = tpu.matmul %0, %1, %cst {dimension_numbers = #tpu.dot_dimension_numbers<[1], [1], [0], [0], [0, 0, 1, 0], [], []>} : vector<8x5xf32>, vector<16x5xf32>, vector<8x16xf32> -> vector<8x16xf32>
    %c0_3 = arith.constant 0 : index
    %c0_4 = arith.constant 0 : index
    %3 = vector.load %arg3[%c0_3, %c0_4] : memref<1x16xf32, #tpu.memory_space<vmem>>, vector<1x16xf32>
    %4 = vector.broadcast %3 : vector<1x16xf32> to vector<8x16xf32>
    %5 = arith.addf %2, %4 : vector<8x16xf32>
    %cst_5 = arith.constant 0.000000e+00 : f32
    %6 = vector.broadcast %cst_5 : f32 to vector<8x16xf32>
    %7 = arith.maximumf %5, %6 : vector<8x16xf32>
    %c0_6 = arith.constant 0 : index
    %c0_7 = arith.constant 0 : index
    %8 = vector.load %arg4[%c0_6, %c0_7] : memref<4x16xf32, #tpu.memory_space<vmem>>, vector<4x16xf32>
    %cst_8 = arith.constant dense<0.000000e+00> : vector<8x4xf32>
    %9 = tpu.matmul %7, %8, %cst_8 {dimension_numbers = #tpu.dot_dimension_numbers<[1], [1], [0], [0], [0, 0, 1, 0], [], []>} : vector<8x16xf32>, vector<4x16xf32>, vector<8x4xf32> -> vector<8x4xf32>
    %c0_9 = arith.constant 0 : index
    %c0_10 = arith.constant 0 : index
    %10 = vector.load %arg5[%c0_9, %c0_10] : memref<1x4xf32, #tpu.memory_space<vmem>>, vector<1x4xf32>
    %11 = vector.broadcast %10 : vector<1x4xf32> to vector<8x4xf32>
    %12 = arith.addf %9, %11 : vector<8x4xf32>
    %c0_11 = arith.constant 0 : index
    %c0_12 = arith.constant 0 : index
    %13 = vector.load %arg6[%c0_11, %c0_12] : memref<8x4xf32, #tpu.memory_space<vmem>>, vector<8x4xf32>
    tpu.vector_store %arg6[%c0_11, %c0_12], %12 {strides = array<i32>} : memref<8x4xf32, #tpu.memory_space<vmem>>, vector<8x4xf32>,
    return
  }
  func.func @transform_0(%arg0: i32) -> (i32, i32) {
    %c0_i32 = arith.constant 0 : i32
    %c0_i32_0 = arith.constant 0 : i32
    return %arg0, %c0_i32 : i32, i32
  }
  func.func @transform_1(%arg0: i32) -> (i32, i32) {
    %c0_i32 = arith.constant 0 : i32
    %c0_i32_0 = arith.constant 0 : i32
    %c0_i32_1 = arith.constant 0 : i32
    return %c0_i32, %c0_i32_0 : i32, i32
  }
  func.func @transform_2(%arg0: i32) -> (i32, i32) {
    %c0_i32 = arith.constant 0 : i32
    %c0_i32_0 = arith.constant 0 : i32
    %c0_i32_1 = arith.constant 0 : i32
    return %c0_i32, %c0_i32_0 : i32, i32
  }
  func.func @transform_3(%arg0: i32) -> (i32, i32) {
    %c0_i32 = arith.constant 0 : i32
    %c0_i32_0 = arith.constant 0 : i32
    %c0_i32_1 = arith.constant 0 : i32
    return %c0_i32, %c0_i32_0 : i32, i32
  }
  func.func @transform_4(%arg0: i32) -> (i32, i32) {
    %c0_i32 = arith.constant 0 : i32
    %c0_i32_0 = arith.constant 0 : i32
    %c0_i32_1 = arith.constant 0 : i32
    return %c0_i32, %c0_i32_0 : i32, i32
  }
  func.func @transform_5(%arg0: i32) -> (i32, i32) {
    %c0_i32 = arith.constant 0 : i32
    %c0_i32_0 = arith.constant 0 : i32
    return %arg0, %c0_i32 : i32, i32
  }
}

</mosaic_0001>

<bundles_post_ra>
// kernel: antnet_forward.1
= control target key start
LH: loop header
LB: loop body
LE: loop exit
PB: predicated region body
PF: predicated region fallthrough
CT: control target
= control target key end

     0   :  { %vm30_vm0 = vcmask 39936   ;;  %v228_v0 = vmov 0.0   ;;  %vm229_vm1 = vmmov 0   ;;  %vm119_vm2 = vcmask 130048   ;;  %s281_s1 = inlined_call_operand.vmem [shape: f32[16,5], index: 1, kind: input, shape index: {}]   ;;  %s282_s0 = inlined_call_operand.vmem [shape: f32[8,5], index: 0, kind: input, shape index: {}]   ;;  %s283_s3 = inlined_call_operand.vmem [shape: f32[4,16], index: 3, kind: input, shape index: {}]   ;;  %s284_s2 = inlined_call_operand.vmem [shape: f32[1,16], index: 2, kind: input, shape index: {}]   ;;  %s285_s4 = inlined_call_operand.vmem [shape: f32[1,4], index: 4, kind: input, shape index: {}]   ;;  %s286_s5 = inlined_call_operand.vmem [shape: f32[8,4], index: 5, kind: output, shape index: {}]  }
   0x1   :  { %214 = vmatprep.subr.mxu0 %v228_v0  ;;  %v22_v1 = vld [vmem:[%s281_s1 + $0x8] sm:$0xff]  ;;  %218 = vmatprep.mubr.msk.f32.mxu0 %vm229_vm1, %v228_v0  ;;  %v21_v2 = vld [vmem:[%s281_s1] sm:$0xff]  ;;  %vm196_vm3 = vcmask 31744  }
   0x2   :  { %215 = vmatpush3.xpose.msk.msra.mxu0 %vm30_vm0, %v22_v1  ;;  %221 = vmatprep.subr.mxu1 %v228_v0  ;;  %v20_v3 = vld [vmem:[%s282_s0] sm:$0xff] }
   0x3   :  { %216 = vmatprep.subr.mxu0 %v228_v0  ;;  %223 = vmatprep.mubr.msk.f32.mxu1 %vm229_vm1, %v228_v0  ;;  %v111_v4 = vld [vmem:[%s283_s3] sm:$0xf] }
   0x4   :  { %222 = vmatpush3.xpose.msk.msra.mxu1 %vm119_vm2, %v111_v4  ;;  %v202_v5 = vld [vmem:[%s284_s2] ss:$0 sm:$0xff] }
   0x5   :  { %v206_v10 = vld [vmem:[%s285_s4] ss:$0 sm:$0xff] }
   0x6   :  { %217 = vmatpush3.xpose.msk.msra.mxu0 %vm30_vm0, %v21_v2 }
   0x9   :  { %219 = vmatmul.mubr.msk.f32.vlgmr.msra.gmra.mxu0 %vm30_vm0, %v20_v3 }
  0xc9   :  { %v106_v6 = vpop.f32.mrf.mxu0 }
  0xca   :  { %v107_v7 = vadd.f32 %v202_v5, %v106_v6 }
  0xcb   :  { %v220_v8 = vpop.f32.mrf.mxu0 }
  0xcc   :  { %v110_v9 = vmax.f32 %v107_v7, 0.0 }
  0xce   :  { %224 = vmatmul.mubr.msk.f32.vlgmr.msra.gmra.mxu1 %vm119_vm2, %v110_v9 }
 0x18e   :  { %v192_v11 = vpop.f32.mrf.mxu1 }
 0x18f   :  { %v193_v12 = vadd.f32 %v206_v10, %v192_v11 }
 0x190   :  { %v225_v13 = vpop.f32.mrf.mxu1 }
 0x191   :  { %197 = vst.msk [vmem:[%s286_s5] sm:$0xff] %vm196_vm3, %v193_v12 }

</bundles_post_ra>
